<compile_context>
chip_gen: v7x
topology: tpu7x:2x2x1
jax: 0.10.0
libtpu: 0.0.40
codegen_flags: <defaults>
</compile_context>

<pallas_src>
import jax
import jax.numpy as jnp
from jax.experimental import pallas as pl
from jax.experimental.pallas import tpu as pltpu

NEG_SLOPE = 0.2      # GATConv default negative_slope for LeakyReLU
NEG_INF = -1e30      # mask value for non-edges (exp() underflows to 0)


def _masked_attention(e, adj_mask):
    """LeakyReLU -> edge mask -> row-wise softmax (denominator on the EUP)."""
    e = jnp.where(e > 0, e, NEG_SLOPE * e)                    # LeakyReLU(0.2)
    e = jnp.where(adj_mask, e, NEG_INF)                       # only real edges
    m = jnp.max(e, axis=1, keepdims=True)
    p = jnp.exp(e - m)
    denom = jnp.sum(p, axis=1, keepdims=True)
    return p * pl.reciprocal(denom, approx=True)


def gat_net_kernel(x_ref, edges_ref, p1_ref, s2_ref, out_ref):
    x = x_ref[...]                        # [N, 1]  node features
    edges = edges_ref[...]                # [2, E]  int32: row0 = src, row1 = dst
    n = x.shape[0]
    e_cnt = edges.shape[1]
    src_row = edges[0:1, :]               # [1, E]  message source
    dst_row = edges[1:2, :]               # [1, E]  message target

    # ---- adjacency mask built in-kernel: adj[i, j] = edge j -> i, or i == j ----
    # Both one-hots share the same [N, E] orientation (iota on sublanes, edge
    # list lane-dense); contract over the shared E axis on the MXU in bf16
    # (0/1 exact), accumulate f32.
    node_i = jax.lax.broadcasted_iota(jnp.int32, (n, e_cnt), 0)
    dst_oh = (node_i == dst_row).astype(jnp.bfloat16)          # [N, E]
    src_oh = (node_i == src_row).astype(jnp.bfloat16)          # [N, E]
    counts = jax.lax.dot_general(
        dst_oh, src_oh,
        dimension_numbers=(((1,), (1,)), ((), ())),
        preferred_element_type=jnp.float32)                    # [N, N]
    row_i = jax.lax.broadcasted_iota(jnp.int32, (n, n), 0)
    col_i = jax.lax.broadcasted_iota(jnp.int32, (n, n), 1)
    # NOTE: duplicate edges collapse to one (same as the dense-adj reference);
    # PyG's edge-wise softmax would weight duplicates separately on multigraphs.
    adj = jnp.logical_or(counts > 0.0, row_i == col_i)         # + self-loops

    p1 = p1_ref[...]                      # [5, 16]: w1, att_src1, att_dst1, b1, w2t
    w1, as1, ad1, b1 = p1[0:1, :], p1[1:2, :], p1[2:3, :], p1[3:4, :]
    w2t = p1[4:5, :]                      # conv2 lin weight (lane-dense row form)
    as2 = s2_ref[0]                       # scalar att_src2
    ad2 = s2_ref[1]                       # scalar att_dst2
    b2 = s2_ref[2]                        # scalar bias2

    # ---- conv1: GATConv(1 -> 16), heads=1 ----
    # Fin == 1: outer-product broadcast on the VPU (a K=1 matmul would idle the MXU).
    h1 = x * w1                                               # [N, 16]
    s_src1 = jnp.sum(h1 * as1, axis=1, keepdims=True)         # [N, 1]
    s_dst1 = jnp.sum(h1 * ad1, axis=1, keepdims=True)         # [N, 1]
    e1 = s_dst1 + s_src1.T                                    # [N, N]
    alpha1 = _masked_attention(e1, adj)
    h1 = jnp.dot(alpha1, h1, preferred_element_type=jnp.float32) + b1   # [N, 16]
    h1 = jnp.maximum(h1, 0.0)                                 # ReLU
    # TODO(synk): F.dropout is treated as inference-mode identity (no RNG mask).

    # ---- conv2: GATConv(16 -> 1), heads=1 ----
    # Fout == 1: VPU multiply + lane reduce (MXU result tile would be 1/128 used).
    h2 = jnp.sum(h1 * w2t, axis=1, keepdims=True)             # [N, 1]
    h2t = h2.T                                                # [1, N] lane-dense
    e2 = h2 * ad2 + h2t * as2                                 # [N, N]
    alpha2 = _masked_attention(e2, adj)
    out = jnp.sum(alpha2 * h2t, axis=1, keepdims=True) + b2   # [N, 1]

    # log_softmax over dim=1 (feature axis). With Fout == 1 this is identically
    # zero, faithfully matching the PyTorch module as written.
    m = jnp.max(out, axis=1, keepdims=True)
    lse = jnp.log(jnp.sum(jnp.exp(out - m), axis=1, keepdims=True)) + m
    out_ref[...] = (out - lse).T                              # lane-dense [1, N]


def pack_gat_params(params):
    """One-time parameter packing (hoisted out of the per-call path)."""
    f_hidden = params["w1"].shape[1]
    p1 = jnp.concatenate(
        [params["w1"], params["as1"], params["ad1"], params["b1"],
         params["w2"].reshape(1, f_hidden)], axis=0)              # [5, 16]
    s2 = jnp.concatenate(
        [params["as2"].reshape(1), params["ad2"].reshape(1),
         params["b2"].reshape(1)], axis=0)                        # [3] (SMEM)
    return p1, s2


def gat_net(x, edge_index, p1, s2):
    """x: [N, 1] f32, edge_index: [2, E] int32, (p1, s2) from pack_gat_params."""
    n = x.shape[0]
    edges = edge_index.astype(jnp.int32)                          # [2, E]
    vmem = pl.BlockSpec(memory_space=pltpu.MemorySpace.VMEM)
    smem = pl.BlockSpec(memory_space=pltpu.MemorySpace.SMEM)
    out_row = pl.pallas_call(
        gat_net_kernel,
        out_shape=jax.ShapeDtypeStruct((1, n), jnp.float32),      # lane-dense
        in_specs=[vmem, vmem, vmem, smem],
        out_specs=vmem,
        compiler_params=pltpu.CompilerParams(
            vmem_limit_bytes=32 * 1024 * 1024),
    )(x, edges, p1, s2)
    return out_row.reshape(n, 1)                                  # [N, 1] as in PyTorch


if __name__ == "__main__":
    key = jax.random.PRNGKey(0)
    kx, ke, k1, k2, k3, k4, k5, k6 = jax.random.split(key, 8)

    N, E = 32, 64                      # small graph: 32 nodes, 64 directed edges
    x = jax.random.normal(kx, (N, 1), dtype=jnp.float32)
    edge_index = jax.random.randint(ke, (2, E), 0, N, dtype=jnp.int32)

    # Deterministic parameter init (shapes match GATConv(1,16) / GATConv(16,1),
    # heads=1): lin weight [Fin, Fout], att_src/att_dst [1, Fout], bias [1, Fout].
    params = dict(
        w1=jax.random.normal(k1, (1, 16), dtype=jnp.float32) * 0.5,
        as1=jax.random.normal(k2, (1, 16), dtype=jnp.float32) * 0.5,
        ad1=jax.random.normal(k3, (1, 16), dtype=jnp.float32) * 0.5,
        b1=jnp.zeros((1, 16), dtype=jnp.float32),
        w2=jax.random.normal(k4, (16, 1), dtype=jnp.float32) * 0.5,
        as2=jax.random.normal(k5, (1, 1), dtype=jnp.float32) * 0.5,
        ad2=jax.random.normal(k6, (1, 1), dtype=jnp.float32) * 0.5,
        b2=jnp.zeros((1, 1), dtype=jnp.float32),
    )

    # Pack params once (steady-state call path contains only the pallas_call).
    p1, s2 = pack_gat_params(params)
    run = jax.jit(gat_net)

    out = run(x, edge_index, p1, s2)
    jax.block_until_ready(out)
    assert out.shape == (N, 1)
    print("KERNEL_OK")
</pallas_src>

<mosaic_0001>
module attributes {stable_mosaic.version = 11 : i64} {
  func.func @gat_net_kernel(%arg0: memref<32x1xf32, #tpu.memory_space<vmem>>, %arg1: memref<2x64xi32, #tpu.memory_space<vmem>>, %arg2: memref<5x16xf32, #tpu.memory_space<vmem>>, %arg3: memref<3xf32, #tpu.memory_space<smem>>, %arg4: memref<1x32xf32, #tpu.memory_space<vmem>>) attributes {dimension_semantics = [], scalar_prefetch = 0 : i64, scratch_operands = 0 : i64, tpu.core_type = #tpu.core_type<tc>} {
    %c0 = arith.constant 0 : index
    %c0_0 = arith.constant 0 : index
    %0 = vector.load %arg0[%c0, %c0_0] : memref<32x1xf32, #tpu.memory_space<vmem>>, vector<32x1xf32>
    %c0_1 = arith.constant 0 : index
    %c0_2 = arith.constant 0 : index
    %1 = vector.load %arg1[%c0_1, %c0_2] : memref<2x64xi32, #tpu.memory_space<vmem>>, vector<2x64xi32>
    %2 = vector.extract_strided_slice %1 {offsets = [0, 0], sizes = [1, 64], strides = [1, 1]} : vector<2x64xi32> to vector<1x64xi32>
    %3 = vector.extract_strided_slice %1 {offsets = [1, 0], sizes = [1, 64], strides = [1, 1]} : vector<2x64xi32> to vector<1x64xi32>
    %4 = tpu.iota {dimensions = array<i32: 0>} : vector<32x64xi32>
    %5 = vector.broadcast %3 : vector<1x64xi32> to vector<32x64xi32>
    %6 = arith.cmpi eq, %4, %5 : vector<32x64xi32>
    %7 = arith.extui %6 : vector<32x64xi1> to vector<32x64xi32>
    %8 = arith.sitofp %7 : vector<32x64xi32> to vector<32x64xf32>
    %9 = arith.truncf %8 : vector<32x64xf32> to vector<32x64xbf16>
    %10 = vector.broadcast %2 : vector<1x64xi32> to vector<32x64xi32>
    %11 = arith.cmpi eq, %4, %10 : vector<32x64xi32>
    %12 = arith.extui %11 : vector<32x64xi1> to vector<32x64xi32>
    %13 = arith.sitofp %12 : vector<32x64xi32> to vector<32x64xf32>
    %14 = arith.truncf %13 : vector<32x64xf32> to vector<32x64xbf16>
    %cst = arith.constant dense<0.000000e+00> : vector<32x32xf32>
    %15 = tpu.matmul %9, %14, %cst {dimension_numbers = #tpu.dot_dimension_numbers<[1], [1], [0], [0], [0, 0, 1, 0], [], []>} : vector<32x64xbf16>, vector<32x64xbf16>, vector<32x32xf32> -> vector<32x32xf32>
    %16 = tpu.iota {dimensions = array<i32: 0>} : vector<32x32xi32>
    %17 = tpu.iota {dimensions = array<i32: 1>} : vector<32x32xi32>
    %cst_3 = arith.constant 0.000000e+00 : f32
    %18 = vector.broadcast %cst_3 : f32 to vector<32x32xf32>
    %19 = arith.cmpf ogt, %15, %18 : vector<32x32xf32>
    %20 = arith.cmpi eq, %16, %17 : vector<32x32xi32>
    %21 = arith.ori %19, %20 : vector<32x32xi1>
    %c0_4 = arith.constant 0 : index
    %c0_5 = arith.constant 0 : index
    %22 = vector.load %arg2[%c0_4, %c0_5] : memref<5x16xf32, #tpu.memory_space<vmem>>, vector<5x16xf32>
    %23 = vector.extract_strided_slice %22 {offsets = [0, 0], sizes = [1, 16], strides = [1, 1]} : vector<5x16xf32> to vector<1x16xf32>
    %24 = vector.extract_strided_slice %22 {offsets = [1, 0], sizes = [1, 16], strides = [1, 1]} : vector<5x16xf32> to vector<1x16xf32>
    %25 = vector.extract_strided_slice %22 {offsets = [2, 0], sizes = [1, 16], strides = [1, 1]} : vector<5x16xf32> to vector<1x16xf32>
    %26 = vector.extract_strided_slice %22 {offsets = [3, 0], sizes = [1, 16], strides = [1, 1]} : vector<5x16xf32> to vector<1x16xf32>
    %27 = vector.extract_strided_slice %22 {offsets = [4, 0], sizes = [1, 16], strides = [1, 1]} : vector<5x16xf32> to vector<1x16xf32>
    %c0_6 = arith.constant 0 : index
    %28 = memref.load %arg3[%c0_6] : memref<3xf32, #tpu.memory_space<smem>>
    %c1 = arith.constant 1 : index
    %29 = memref.load %arg3[%c1] : memref<3xf32, #tpu.memory_space<smem>>
    %c2 = arith.constant 2 : index
    %30 = memref.load %arg3[%c2] : memref<3xf32, #tpu.memory_space<smem>>
    %31 = vector.broadcast %0 : vector<32x1xf32> to vector<32x16xf32>
    %32 = vector.broadcast %23 : vector<1x16xf32> to vector<32x16xf32>
    %33 = arith.mulf %31, %32 : vector<32x16xf32>
    %34 = vector.broadcast %24 : vector<1x16xf32> to vector<32x16xf32>
    %35 = arith.mulf %33, %34 : vector<32x16xf32>
    %cst_7 = arith.constant dense<0.000000e+00> : vector<32xf32>
    %36 = vector.multi_reduction <add>, %35, %cst_7 [1] : vector<32x16xf32> to vector<32xf32>
    %37 = vector.shape_cast %36 : vector<32xf32> to vector<32x1xf32>
    %38 = vector.broadcast %25 : vector<1x16xf32> to vector<32x16xf32>
    %39 = arith.mulf %33, %38 : vector<32x16xf32>
    %cst_8 = arith.constant dense<0.000000e+00> : vector<32xf32>
    %40 = vector.multi_reduction <add>, %39, %cst_8 [1] : vector<32x16xf32> to vector<32xf32>
    %41 = vector.shape_cast %40 : vector<32xf32> to vector<32x1xf32>
    %42 = tpu.transpose %37, [1, 0] : vector<32x1xf32> -> vector<1x32xf32>
    %43 = vector.broadcast %41 : vector<32x1xf32> to vector<32x32xf32>
    %44 = vector.broadcast %42 : vector<1x32xf32> to vector<32x32xf32>
    %45 = arith.addf %43, %44 : vector<32x32xf32>
    %cst_9 = arith.constant 0.000000e+00 : f32
    %46 = vector.broadcast %cst_9 : f32 to vector<32x32xf32>
    %47 = arith.cmpf ogt, %45, %46 : vector<32x32xf32>
    %cst_10 = arith.constant 2.000000e-01 : f32
    %48 = vector.broadcast %cst_10 : f32 to vector<32x32xf32>
    %49 = arith.mulf %48, %45 : vector<32x32xf32>
    %50 = arith.select %47, %45, %49 : vector<32x32xi1>, vector<32x32xf32>
    %cst_11 = arith.constant -1.000000e+30 : f32
    %51 = vector.broadcast %cst_11 : f32 to vector<32x32xf32>
    %52 = arith.select %21, %50, %51 : vector<32x32xi1>, vector<32x32xf32>
    %cst_12 = arith.constant dense<0xFF800000> : vector<32xf32>
    %53 = vector.multi_reduction <maximumf>, %52, %cst_12 [1] : vector<32x32xf32> to vector<32xf32>
    %54 = vector.shape_cast %53 : vector<32xf32> to vector<32x1xf32>
    %55 = vector.broadcast %54 : vector<32x1xf32> to vector<32x32xf32>
    %56 = arith.subf %52, %55 : vector<32x32xf32>
    %57 = math.exp %56 : vector<32x32xf32>
    %cst_13 = arith.constant dense<0.000000e+00> : vector<32xf32>
    %58 = vector.multi_reduction <add>, %57, %cst_13 [1] : vector<32x32xf32> to vector<32xf32>
    %59 = vector.shape_cast %58 : vector<32xf32> to vector<32x1xf32>
    %60 = tpu.reciprocal %59 {approx = true} : vector<32x1xf32> -> vector<32x1xf32>
    %61 = vector.broadcast %60 : vector<32x1xf32> to vector<32x32xf32>
    %62 = arith.mulf %57, %61 : vector<32x32xf32>
    %cst_14 = arith.constant dense<0.000000e+00> : vector<32x16xf32>
    %63 = tpu.matmul %62, %33, %cst_14 {dimension_numbers = #tpu.dot_dimension_numbers<[1], [0], [0], [1], [0, 0, 1, 1], [], []>} : vector<32x32xf32>, vector<32x16xf32>, vector<32x16xf32> -> vector<32x16xf32>
    %64 = vector.broadcast %26 : vector<1x16xf32> to vector<32x16xf32>
    %65 = arith.addf %63, %64 : vector<32x16xf32>
    %cst_15 = arith.constant 0.000000e+00 : f32
    %66 = vector.broadcast %cst_15 : f32 to vector<32x16xf32>
    %67 = arith.maximumf %65, %66 : vector<32x16xf32>
    %68 = vector.broadcast %27 : vector<1x16xf32> to vector<32x16xf32>
    %69 = arith.mulf %67, %68 : vector<32x16xf32>
    %cst_16 = arith.constant dense<0.000000e+00> : vector<32xf32>
    %70 = vector.multi_reduction <add>, %69, %cst_16 [1] : vector<32x16xf32> to vector<32xf32>
    %71 = vector.shape_cast %70 : vector<32xf32> to vector<32x1xf32>
    %72 = tpu.transpose %71, [1, 0] : vector<32x1xf32> -> vector<1x32xf32>
    %73 = vector.broadcast %29 : f32 to vector<32x1xf32>
    %74 = arith.mulf %71, %73 : vector<32x1xf32>
    %75 = vector.broadcast %28 : f32 to vector<1x32xf32>
    %76 = arith.mulf %72, %75 : vector<1x32xf32>
    %77 = vector.broadcast %74 : vector<32x1xf32> to vector<32x32xf32>
    %78 = vector.broadcast %76 : vector<1x32xf32> to vector<32x32xf32>
    %79 = arith.addf %77, %78 : vector<32x32xf32>
    %cst_17 = arith.constant 0.000000e+00 : f32
    %80 = vector.broadcast %cst_17 : f32 to vector<32x32xf32>
    %81 = arith.cmpf ogt, %79, %80 : vector<32x32xf32>
    %cst_18 = arith.constant 2.000000e-01 : f32
    %82 = vector.broadcast %cst_18 : f32 to vector<32x32xf32>
    %83 = arith.mulf %82, %79 : vector<32x32xf32>
    %84 = arith.select %81, %79, %83 : vector<32x32xi1>, vector<32x32xf32>
    %cst_19 = arith.constant -1.000000e+30 : f32
    %85 = vector.broadcast %cst_19 : f32 to vector<32x32xf32>
    %86 = arith.select %21, %84, %85 : vector<32x32xi1>, vector<32x32xf32>
    %cst_20 = arith.constant dense<0xFF800000> : vector<32xf32>
    %87 = vector.multi_reduction <maximumf>, %86, %cst_20 [1] : vector<32x32xf32> to vector<32xf32>
    %88 = vector.shape_cast %87 : vector<32xf32> to vector<32x1xf32>
    %89 = vector.broadcast %88 : vector<32x1xf32> to vector<32x32xf32>
    %90 = arith.subf %86, %89 : vector<32x32xf32>
    %91 = math.exp %90 : vector<32x32xf32>
    %cst_21 = arith.constant dense<0.000000e+00> : vector<32xf32>
    %92 = vector.multi_reduction <add>, %91, %cst_21 [1] : vector<32x32xf32> to vector<32xf32>
    %93 = vector.shape_cast %92 : vector<32xf32> to vector<32x1xf32>
    %94 = tpu.reciprocal %93 {approx = true} : vector<32x1xf32> -> vector<32x1xf32>
    %95 = vector.broadcast %94 : vector<32x1xf32> to vector<32x32xf32>
    %96 = arith.mulf %91, %95 : vector<32x32xf32>
    %97 = vector.broadcast %72 : vector<1x32xf32> to vector<32x32xf32>
    %98 = arith.mulf %96, %97 : vector<32x32xf32>
    %cst_22 = arith.constant dense<0.000000e+00> : vector<32xf32>
    %99 = vector.multi_reduction <add>, %98, %cst_22 [1] : vector<32x32xf32> to vector<32xf32>
    %100 = vector.shape_cast %99 : vector<32xf32> to vector<32x1xf32>
    %101 = vector.broadcast %30 : f32 to vector<32x1xf32>
    %102 = arith.addf %100, %101 : vector<32x1xf32>
    %cst_23 = arith.constant dense<0xFF800000> : vector<32xf32>
    %103 = vector.multi_reduction <maximumf>, %102, %cst_23 [1] : vector<32x1xf32> to vector<32xf32>
    %104 = vector.shape_cast %103 : vector<32xf32> to vector<32x1xf32>
    %105 = arith.subf %102, %104 : vector<32x1xf32>
    %106 = math.exp %105 : vector<32x1xf32>
    %cst_24 = arith.constant dense<0.000000e+00> : vector<32xf32>
    %107 = vector.multi_reduction <add>, %106, %cst_24 [1] : vector<32x1xf32> to vector<32xf32>
    %108 = vector.shape_cast %107 : vector<32xf32> to vector<32x1xf32>
    %109 = math.log %108 : vector<32x1xf32>
    %110 = arith.addf %109, %104 : vector<32x1xf32>
    %111 = arith.subf %102, %110 : vector<32x1xf32>
    %112 = tpu.transpose %111, [1, 0] : vector<32x1xf32> -> vector<1x32xf32>
    %c0_25 = arith.constant 0 : index
    %c0_26 = arith.constant 0 : index
    %113 = vector.load %arg4[%c0_25, %c0_26] : memref<1x32xf32, #tpu.memory_space<vmem>>, vector<1x32xf32>
    tpu.vector_store %arg4[%c0_25, %c0_26], %112 {strides = array<i32>} : memref<1x32xf32, #tpu.memory_space<vmem>>, vector<1x32xf32>,
    return
  }
}

</mosaic_0001>

<bundles_post_ra>
// kernel: gat_net.1
= control target key start
LH: loop header
LB: loop body
LE: loop exit
PB: predicated region body
PF: predicated region fallthrough
CT: control target
= control target key end

     0   :  { %9 = vsyncpa [#allocation4], 0  ;;  %s1002_s0 = inlined_call_operand.vmem [shape: f32[32,1], index: 0, kind: input, shape index: {}]   ;;  %s1003_s1 = inlined_call_operand.vmem [shape: s32[2,64], index: 1, kind: input, shape index: {}]   ;;  %s1004_s2 = inlined_call_operand.vmem [shape: f32[5,16], index: 2, kind: input, shape index: {}]   ;;  %s1005_s3 = inlined_call_operand.vmem [shape: f32[3], index: 3, kind: input, shape index: {}]   ;;  %s1006_s4 = inlined_call_operand.hbm [shape: f32[1,32], index: 4, kind: output, shape index: {}]  }
   0x1   :  { %10 = vsyncpa [#allocation3], 0  ;;  %s23_s17 = sshll.u32 %s1005_s3, 4  ;;  %s24_s17 = int_to_ptr.vmem [resolvable:$true] %s23_s17 }
   0x2   :  { %s780_s18 = scalar_lea.vmem %s24_s17, 16  ;;  %p785_p1 = scmp.lt.s32.totalorder %s24_s17, %s24_s17 }
   0x3   :  { %p781_p0 = scmp.ne.s32.totalorder %s24_s17, %s780_s18  ;;  %p786_p2 = scmp.lt.s32.totalorder %s780_s18, %s780_s18 }
   0x5   :  { %p787_p3 = por %p786_p2, %p785_p1 }
   0x7   :  { %p788_p4 = pnand %p787_p3, %p781_p0 }
   0x9   :  { %791 = shalt.err (!%p788_p4)
}
   0xa   :  { %s818_s19 = smov [#allocation2]  }
   0xb   :  { %26 = dma.vmem_to_smem %s24_s17, 16, %s818_s19, [#allocation4]  }
   0xc   :  { %814 = dma.done.wait [#allocation4], 16  }
   0xd   :  { %815 = vsyncadd [#allocation4], 4294967280 }
   0xe   :  { %30 = sfence }
   0xf   :  { %v32_v0 = vld [vmem:[%s1002_s0] sm:$0xff]  ;;  %v34_v1 = vld [vmem:[%s1002_s0 + $0x10] sm:$0xff]  ;;  %v819_v2 = vmov 0   ;;  %v33_v3 = vld [vmem:[%s1002_s0 + $0x8] sm:$0xff]  ;;  %v37_v5 = vlaneseq  ;;  %vm78_vm0 = vcmask 523264   ;;  %v820_v15 = vmov 0.0  }
  0x10   :  { %730 = vset.pattern.permute.xlu0 %v819_v2  ;;  %731 = vset.pattern.permute.xlu1 %v819_v2  ;;  %v35_v4 = vld [vmem:[%s1002_s0 + $0x18] sm:$0xff]  ;;  %v36_v9 = vld [vmem:[%s1003_s1] sm:$0x3]  ;;  %vm194_vm9 = vcmask 130048   ;;  %s676_s29 = sld [smem:[#allocation2 + $0x1]]  ;;  %s677_s30 = sld [smem:[#allocation2 + $0x2]] }
  0x11   :  { %160 = vperm.xlu0 %730, %v32_v0   ;;  %170 = vperm.xlu1 %731, %v34_v1   ;;  %v863_v6 = vshrl.u32 %v37_v5, 7  ;;  %v899_v30 = vld [vmem:[%s1004_s2] sm:$0x1f]  ;;  %s155_s2 = sld [smem:[#allocation2]]  ;;  %s821_s5 = smov [#allocation5]  }
  0x12   :  { %s657_s6 = sshll.u32 %s821_s5, 4  ;;  %s658_s6 = int_to_ptr.vmem [resolvable:$true] %s657_s6 }
  0x13   :  { %v866_v7 = vsub.s32 0, %v863_v6  ;;  %v44_v8 = vsub.s32 1, %v863_v6  ;;  %v873_v10 = vadd.s32 8, %v863_v6  ;;  %v876_v11 = vadd.s32 16, %v863_v6  ;;  %s792_s7 = scalar_lea.vmem %s658_s6, 16  ;;  %s796_s8 = scalar_lea.vmem %s658_s6, 32 }
  0x14   :  { %v880_v13 = vadd.s32 24, %v863_v6  ;;  %v209_v37 = vsub.s32 2, %v863_v6  ;;  %p793_p5 = scmp.ne.s32.totalorder %s658_s6, %s792_s7  ;;  %p797_p6 = scmp.lt.s32.totalorder %s658_s6, %s658_s6 }
  0x15   :  { %165 = vperm.xlu0 %730, %v33_v3   ;;  %175 = vperm.xlu1 %731, %v35_v4   ;;  %v63_v12 = vrot.slane %v36_v9, %v866_v7  ;;  %v45_v14 = vrot.slane %v36_v9, %v44_v8  ;;  %v181_v31 = vrot.slane %v899_v30, %v866_v7  ;;  %p798_p7 = scmp.lt.s32.totalorder %s796_s8, %s792_s7 }
  0x16   :  { %v189_v32 = vrot.slane %v899_v30, %v44_v8  ;;  %v210_v46 = vrot.slane %v899_v30, %v209_v37 }
  0x17   :  { %vm64_vm1 = vcmp.eq.s32.totalorder %v863_v6, %v63_v12  ;;  %vm65_vm2 = vcmp.eq.s32.totalorder %v873_v10, %v63_v12  ;;  %vm66_vm3 = vcmp.eq.s32.totalorder %v876_v11, %v63_v12  ;;  %vm67_vm4 = vcmp.eq.s32.totalorder %v880_v13, %v63_v12  ;;  %p799_p8 = por %p798_p7, %p797_p6 }
  0x18   :  { %v670_v16 = vsel %vm64_vm1, 1.0, %v820_v15  ;;  %v671_v17 = vsel %vm65_vm2, 1.0, %v820_v15  ;;  %v672_v18 = vsel %vm66_vm3, 1.0, %v820_v15  ;;  %v673_v19 = vsel %vm67_vm4, 1.0, %v820_v15 }
  0x19   :  { %v76_v20 = vpack.c.bf16 %v671_v17, %v670_v16  ;;  %v77_v21 = vpack.c.bf16 %v673_v19, %v672_v18  ;;  %vm46_vm5 = vcmp.eq.s32.totalorder %v863_v6, %v45_v14  ;;  %vm47_vm6 = vcmp.eq.s32.totalorder %v873_v10, %v45_v14  ;;  %p800_p9 = pnand %p799_p8, %p793_p5 }
  0x1a   :  { %v666_v22 = vsel %vm46_vm5, 1.0, %v820_v15  ;;  %v667_v23 = vsel %vm47_vm6, 1.0, %v820_v15  ;;  %vm48_vm7 = vcmp.eq.s32.totalorder %v876_v11, %v45_v14  ;;  %vm49_vm8 = vcmp.eq.s32.totalorder %v880_v13, %v45_v14 }
  0x1b   :  { %724 = vmatprep.subr.msk.bf16.mxu0 %vm78_vm0, %v76_v20  ;;  %v86_v24 = vsel %vm78_vm0, %v76_v20, 0  ;;  %v58_v25 = vpack.c.bf16 %v667_v23, %v666_v22  ;;  %v89_v26 = vsel %vm78_vm0, %v77_v21, 0  ;;  %v668_v27 = vsel %vm48_vm7, 1.0, %v820_v15 }
  0x1c   :  { %695 = vmatpush3.bf16.xpose.msra.mxu0 %v86_v24  ;;  %v669_v28 = vsel %vm49_vm8, 1.0, %v820_v15  ;;  %v141_v12 = vand.u32 127, %v37_v5  ;;  %vm283_vm1 = vcmask 261120  }
  0x1d   :  { %725 = vmatprep.subr.msk.bf16.mxu0 %vm78_vm0, %v77_v21  ;;  %698 = vmatprep.mubr.msk.bf16.mxu0 %vm78_vm0, %v58_v25  ;;  %v59_v29 = vpack.c.bf16 %v669_v28, %v668_v27 }
  0x1e   :  { %vm146_vm11 = vcmp.eq.s32.totalorder %v863_v6, %v141_v12  ;;  %vm147_vm13 = vcmp.eq.s32.totalorder %v873_v10, %v141_v12  ;;  %vm148_vm4 = vcmp.eq.s32.totalorder %v876_v11, %v141_v12  ;;  %vm149_vm8 = vcmp.eq.s32.totalorder %v880_v13, %v141_v12 }
  0x1f   :  { %v330_v12 = vsub.s32 3, %v863_v6 }
  0x24   :  { %697 = vmatpush3.bf16.xpose.msra.mxu0 %v89_v26 }
  0x2b   :  { %699 = vmatmul.mubr.msk.bf16.vlgmr.msra.gmra.mrb[0].mxu0 %vm78_vm0, %v59_v29 }
  0x90   :  { %v161_v33 = vpop.permute.xlu0 %160  ;;  %v171_v34 = vpop.permute.xlu1 %170 }
  0x91   :  { %v182_v35 = vmul.f32 %v181_v31, %v161_v33  ;;  %v184_v36 = vmul.f32 %v181_v31, %v171_v34 }
  0x93   :  { %v190_v38 = vmul.f32 %v189_v32, %v182_v35  ;;  %v192_v39 = vmul.f32 %v189_v32, %v184_v36  ;;  %v211_v52 = vmul.f32 %v210_v46, %v182_v35  ;;  %v213_v56 = vmul.f32 %v210_v46, %v184_v36 }
  0x94   :  { %v166_v40 = vpop.permute.xlu0 %165  ;;  %v176_v41 = vpop.permute.xlu1 %175 }
  0x95   :  { %v183_v42 = vmul.f32 %v181_v31, %v166_v40  ;;  %v195_v43 = vsel %vm194_vm9, %v190_v38, 0.0  ;;  %v185_v44 = vmul.f32 %v181_v31, %v176_v41  ;;  %v201_v45 = vsel %vm194_vm9, %v192_v39, 0.0 }
  0x96   :  { %196 = vadd.xlane.f32.xlu0 %v195_v43  ;;  %v215_v55 = vsel %vm194_vm9, %v211_v52, 0.0  ;;  %v221_v59 = vsel %vm194_vm9, %v213_v56, 0.0 }
  0x97   :  { %v716_v47 = vpack.c.bf16 %v183_v42, %v182_v35  ;;  %v191_v48 = vmul.f32 %v189_v32, %v183_v42  ;;  %v720_v49 = vpack.c.bf16 %v185_v44, %v184_v36  ;;  %v193_v50 = vmul.f32 %v189_v32, %v185_v44 }
  0x98   :  { %v212_v54 = vmul.f32 %v210_v46, %v183_v42  ;;  %v214_v58 = vmul.f32 %v210_v46, %v185_v44 }
  0x99   :  { %717 = vmatprep.subr.bf16.mxu1 %v716_v47  ;;  %v198_v51 = vsel %vm194_vm9, %v191_v48, 0.0  ;;  %v204_v53 = vsel %vm194_vm9, %v193_v50, 0.0 }
  0x9a   :  { %202 = vadd.xlane.f32.xlu0 %v201_v45  ;;  %719 = vmatpush3.bf16.msra.mxu1 %v716_v47  ;;  %v218_v57 = vsel %vm194_vm9, %v212_v54, 0.0  ;;  %v224_v60 = vsel %vm194_vm9, %v214_v58, 0.0 }
  0x9b   :  { %199 = vadd.xlane.f32.xlu1 %v198_v51  ;;  %721 = vmatprep.subr.bf16.mxu1 %v720_v49 }
  0x9e   :  { %205 = vadd.xlane.f32.xlu0 %v204_v53  ;;  %723 = vmatpush3.bf16.msra.mxu1 %v720_v49 }
  0x9f   :  { %216 = vadd.xlane.f32.xlu1 %v215_v55 }
  0xa2   :  { %219 = vadd.xlane.f32.xlu0 %v218_v57 }
  0xa3   :  { %222 = vadd.xlane.f32.xlu1 %v221_v59 }
  0xa6   :  { %225 = vadd.xlane.f32.xlu0 %v224_v60 }
  0xfe   :  { %v700_v62 = vpop.f32.mrb[0].mxu0 }
  0xff   :  { %v125_v63 = vpop.f32.mrb[1].mxu0  ;;  %vm144_vm3 = vcmp.gt.f32.partialorder %v700_v62, 0.0 }
 0x100   :  { %v701_v1 = vpop.f32.mrb[2].mxu0  ;;  %vm142_vm10 = vcmp.gt.f32.partialorder %v125_v63, 0.0  ;;  %vm932_vm6 = vmor %vm144_vm3, %vm148_vm4 }
 0x101   :  { %v128_v2 = vpop.f32.mrb[3].mxu0  ;;  %vm918_vm14 = vmor %vm142_vm10, %vm146_vm11  ;;  %vm145_vm7 = vcmp.gt.f32.partialorder %v701_v1, 0.0 }
 0x102   :  { %vm143_vm12 = vcmp.gt.f32.partialorder %v128_v2, 0.0  ;;  %vm940_vm11 = vmor %vm145_vm7, %vm149_vm8 }
 0x103   :  { %vm922_vm2 = vmor %vm143_vm12, %vm147_vm13 }
 0x123   :  { %v197_v61 = vpop.xlane.xlu0 %196 }
 0x124   :  { %227 = vxpose.xlu1.b32.start [1/4] (short) (narrow) %v197_v61, 8 }
 0x127   :  { %v203_v3 = vpop.xlane.xlu0 %202 }
 0x128   :  { %v200_v0 = vpop.xlane.xlu1 %199 }
 0x129   :  { %228 = vxpose.xlu1.b32.cont [2/4] (short) (narrow) %v200_v0, 8 }
 0x12b   :  { %v206_v4 = vpop.xlane.xlu0 %205 }
 0x12c   :  { %v217_v8 = vpop.xlane.xlu1 %216 }
 0x12d   :  { %229 = vxpose.xlu1.b32.cont [3/4] (short) (narrow) %v203_v3, 8 }
 0x12f   :  { %v220_v14 = vpop.xlane.xlu0 %219 }
 0x130   :  { %v223_v9 = vpop.xlane.xlu1 %222 }
 0x131   :  { %230 = vxpose.xlu1.b32.end [4/4] (short) (narrow) %v206_v4, 8 }
 0x133   :  { %v226_v22 = vpop.xlane.xlu0 %225 }
 0x1a5   :  { %v243_v15 = vpop.trf.xlu1 }
 0x1a6   :  { %v262_v16 = vrot.slane %v243_v15, %v866_v7  ;;  %v435_v15 = vsub.s32 4, %v863_v6 }
 0x1a8   :  { %v263_v17 = vadd.f32 %v262_v16, %v217_v8  ;;  %v264_v18 = vadd.f32 %v262_v16, %v220_v14  ;;  %v265_v19 = vadd.f32 %v262_v16, %v223_v9  ;;  %v266_v27 = vadd.f32 %v262_v16, %v226_v22 }
 0x1a9   :  { %v331_v14 = vrot.slane %v899_v30, %v330_v12 }
 0x1aa   :  { %vm267_vm15 = vcmp.gt.f32.partialorder %v263_v17, 0.0  ;;  %v271_v21 = vmul.f32 0.2, %v263_v17  ;;  %vm268_vm0 = vcmp.gt.f32.partialorder %v264_v18, 0.0  ;;  %v272_v5 = vmul.f32 0.2, %v264_v18 }
 0x1ab   :  { %v273_v26 = vmul.f32 0.2, %v265_v19  ;;  %vm269_vm5 = vcmp.gt.f32.partialorder %v265_v19, 0.0  ;;  %v274_v33 = vmul.f32 0.2, %v266_v27  ;;  %vm270_vm10 = vcmp.gt.f32.partialorder %v266_v27, 0.0 }
 0x1ac   :  { %v275_v24 = vsel %vm267_vm15, %v263_v17, %v271_v21  ;;  %v276_v25 = vsel %vm268_vm0, %v264_v18, %v272_v5 }
 0x1ad   :  { %v279_v10 = vsel %vm918_vm14, %v275_v24, -1e+30  ;;  %v280_v29 = vsel %vm922_vm2, %v276_v25, -1e+30  ;;  %v277_v32 = vsel %vm269_vm5, %v265_v19, %v273_v26  ;;  %v278_v36 = vsel %vm270_vm10, %v266_v27, %v274_v33 }
 0x1ae   :  { %v284_v28 = vsel %vm283_vm1, %v279_v10, -inf  ;;  %v287_v11 = vsel %vm283_vm1, %v280_v29, -inf  ;;  %v281_v34 = vsel %vm932_vm6, %v277_v32, -1e+30  ;;  %v282_v38 = vsel %vm940_vm11, %v278_v36, -1e+30 }
 0x1af   :  { %285 = vmax.xlane.f32.xlu0 %v284_v28  ;;  %v290_v37 = vsel %vm283_vm1, %v281_v34, -inf  ;;  %v293_v13 = vsel %vm283_vm1, %v282_v38, -inf  ;;  %v436_v19 = vrot.slane %v899_v30, %v435_v15 }
 0x1b3   :  { %288 = vmax.xlane.f32.xlu0 %v287_v11 }
 0x1b7   :  { %291 = vmax.xlane.f32.xlu0 %v290_v37 }
 0x1bb   :  { %294 = vmax.xlane.f32.xlu0 %v293_v13 }
 0x23c   :  { %v286_v39 = vpop.xlane.xlu0 %285 }
 0x23d   :  { %v296_v40 = vsub.f32 %v279_v10, %v286_v39 }
 0x23f   :  { %v300_v41 = vmul.f32 1.442695, %v296_v40  ;;  %v490_v40 = vstv %s155_s2 }
 0x240   :  { %v289_v42 = vpop.xlane.xlu0 %288 }
 0x241   :  { %732 = vpow2.f32 %v300_v41  ;;  %v297_v43 = vsub.f32 %v280_v29, %v289_v42  ;;  %v485_v41 = vstv %s676_s29 }
 0x243   :  { %v302_v44 = vmul.f32 1.442695, %v297_v43 }
 0x244   :  { %v292_v45 = vpop.xlane.xlu0 %291 }
 0x245   :  { %734 = vpow2.f32 %v302_v44  ;;  %v298_v46 = vsub.f32 %v281_v34, %v292_v45 }
 0x247   :  { %v304_v47 = vmul.f32 1.442695, %v298_v46 }
 0x248   :  { %v295_v48 = vpop.xlane.xlu0 %294 }
 0x249   :  { %736 = vpow2.f32 %v304_v47  ;;  %v299_v49 = vsub.f32 %v282_v38, %v295_v48 }
 0x24b   :  { %v733_v50 = vpop.eup %732  ;;  %v306_v51 = vmul.f32 1.442695, %v299_v49 }
 0x24c   :  { %v308_v52 = vsel %vm283_vm1, %v733_v50, 0.0 }
 0x24d   :  { %738 = vpow2.f32 %v306_v51  ;;  %309 = vadd.xlane.f32.xlu0 %v308_v52 }
 0x24f   :  { %v735_v53 = vpop.eup %734 }
 0x250   :  { %v311_v54 = vsel %vm283_vm1, %v735_v53, 0.0 }
 0x251   :  { %312 = vadd.xlane.f32.xlu0 %v311_v54 }
 0x253   :  { %v737_v55 = vpop.eup %736 }
 0x254   :  { %v314_v56 = vsel %vm283_vm1, %v737_v55, 0.0 }
 0x255   :  { %315 = vadd.xlane.f32.xlu0 %v314_v56 }
 0x257   :  { %v739_v57 = vpop.eup %738 }
 0x258   :  { %v317_v58 = vsel %vm283_vm1, %v739_v57, 0.0 }
 0x259   :  { %318 = vadd.xlane.f32.xlu0 %v317_v58 }
 0x2da   :  { %v310_v59 = vpop.xlane.xlu0 %309 }
 0x2db   :  { %740 = vrcp.f32 %v310_v59 }
 0x2de   :  { %v313_v60 = vpop.xlane.xlu0 %312 }
 0x2df   :  { %742 = vrcp.f32 %v313_v60 }
 0x2e2   :  { %v316_v61 = vpop.xlane.xlu0 %315 }
 0x2e3   :  { %744 = vrcp.f32 %v316_v61 }
 0x2e5   :  { %v741_v62 = vpop.eup %740 }
 0x2e6   :  { %v319_v63 = vpop.xlane.xlu0 %318  ;;  %v324_v0 = vmul.f32 %v741_v62, %v733_v50 }
 0x2e7   :  { %746 = vrcp.f32 %v319_v63 }
 0x2e8   :  { %710 = vmatprep.mubr.msk.f32.mxu1 %vm283_vm1, %v324_v0 }
 0x2e9   :  { %v743_v1 = vpop.eup %742 }
 0x2ea   :  { %v325_v2 = vmul.f32 %v743_v1, %v735_v53 }
 0x2ec   :  { %711 = vmatmul.mubr.msk.f32.vlgmr.msra.gmra.mrb[0].mxu1 %vm283_vm1, %v325_v2 }
 0x2ed   :  { %v745_v3 = vpop.eup %744 }
 0x2ee   :  { %v326_v4 = vmul.f32 %v745_v3, %v737_v55 }
 0x2f0   :  { %713 = vmatprep.mubr.msk.f32.mxu1 %vm283_vm1, %v326_v4 }
 0x2f1   :  { %v747_v8 = vpop.eup %746 }
 0x2f2   :  { %v327_v9 = vmul.f32 %v747_v8, %v739_v57 }
 0x2f4   :  { %714 = vmatmul.mubr.msk.f32.gmra.mrb[2].mxu1 %vm283_vm1, %v327_v9 }
 0x3bf   :  { %v712_v16 = vpop.f32.mrb[0].mxu1 }
 0x3c0   :  { %v416_v17 = vadd.f32 %v712_v16, %v331_v14  ;;  %v410_v18 = vpop.f32.mrb[1].mxu1 }
 0x3c1   :  { %v411_v21 = vadd.f32 %v410_v18, %v331_v14 }
 0x3c2   :  { %v430_v5 = vmax.f32 %v416_v17, 0.0 }
 0x3c3   :  { %v429_v22 = vmax.f32 %v411_v21, 0.0 }
 0x3c4   :  { %v438_v24 = vmul.f32 %v436_v19, %v430_v5 }
 0x3c5   :  { %v437_v26 = vmul.f32 %v436_v19, %v429_v22 }
 0x3c6   :  { %v444_v25 = vsel %vm194_vm9, %v438_v24, 0.0 }
 0x3c7   :  { %445 = vadd.xlane.f32.xlu0 %v444_v25  ;;  %v715_v27 = vpop.f32.mrb[2].mxu1  ;;  %v441_v32 = vsel %vm194_vm9, %v437_v26, 0.0 }
 0x3c8   :  { %v426_v10 = vadd.f32 %v715_v27, %v331_v14  ;;  %v420_v28 = vpop.f32.mrb[3].mxu1 }
 0x3c9   :  { %v421_v29 = vadd.f32 %v420_v28, %v331_v14 }
 0x3ca   :  { %v432_v6 = vmax.f32 %v426_v10, 0.0 }
 0x3cb   :  { %v431_v33 = vmax.f32 %v421_v29, 0.0  ;;  %442 = vadd.xlane.f32.xlu0 %v441_v32 }
 0x3cc   :  { %v440_v34 = vmul.f32 %v436_v19, %v432_v6 }
 0x3cd   :  { %v439_v11 = vmul.f32 %v436_v19, %v431_v33 }
 0x3ce   :  { %v450_v36 = vsel %vm194_vm9, %v440_v34, 0.0 }
 0x3cf   :  { %v447_v30 = vsel %vm194_vm9, %v439_v11, 0.0 }
 0x3d0   :  { %448 = vadd.xlane.f32.xlu0 %v447_v30 }
 0x3d4   :  { %451 = vadd.xlane.f32.xlu0 %v450_v36 }
 0x454   :  { %v446_v37 = vpop.xlane.xlu0 %445 }
 0x455   :  { %v487_v44 = vmul.f32 %v485_v41, %v446_v37 }
 0x458   :  { %v443_v38 = vpop.xlane.xlu0 %442 }
 0x459   :  { %453 = vxpose.xlu0.b32.start [1/4] (short) (narrow) %v443_v38, 8  ;;  %v486_v45 = vmul.f32 %v485_v41, %v443_v38 }
 0x45d   :  { %454 = vxpose.xlu0.b32.cont [2/4] (short) (narrow) %v446_v37, 8  ;;  %v449_v13 = vpop.xlane.xlu0 %448 }
 0x45e   :  { %v488_v46 = vmul.f32 %v485_v41, %v449_v13 }
 0x461   :  { %455 = vxpose.xlu0.b32.cont [3/4] (short) (narrow) %v449_v13, 8  ;;  %v452_v39 = vpop.xlane.xlu0 %451 }
 0x462   :  { %v489_v47 = vmul.f32 %v485_v41, %v452_v39 }
 0x465   :  { %456 = vxpose.xlu0.b32.end [4/4] (short) (narrow) %v452_v39, 8 }
 0x4d9   :  { %v964_v42 = vpop.trf.xlu0 }
 0x4da   :  { %v491_v43 = vmul.f32 %v490_v40, %v964_v42  ;;  %v563_v6 = vrot.slane %v964_v42, %v866_v7 }
 0x4dc   :  { %v495_v48 = vrot.slane %v491_v43, %v866_v7 }
 0x4de   :  { %v499_v49 = vadd.f32 %v495_v48, %v489_v47  ;;  %v496_v50 = vadd.f32 %v495_v48, %v486_v45  ;;  %v497_v51 = vadd.f32 %v495_v48, %v487_v44  ;;  %v498_v52 = vadd.f32 %v495_v48, %v488_v46 }
 0x4df   :  { %v580_v46 = vstv %s677_s30 }
 0x4e0   :  { %vm503_vm9 = vcmp.gt.f32.partialorder %v499_v49, 0.0  ;;  %v507_v53 = vmul.f32 0.2, %v499_v49  ;;  %vm500_vm12 = vcmp.gt.f32.partialorder %v496_v50, 0.0  ;;  %v504_v54 = vmul.f32 0.2, %v496_v50 }
 0x4e1   :  { %vm501_vm13 = vcmp.gt.f32.partialorder %v497_v51, 0.0  ;;  %v505_v55 = vmul.f32 0.2, %v497_v51  ;;  %v506_v58 = vmul.f32 0.2, %v498_v52  ;;  %vm502_vm15 = vcmp.gt.f32.partialorder %v498_v52, 0.0 }
 0x4e2   :  { %v511_v56 = vsel %vm503_vm9, %v499_v49, %v507_v53  ;;  %v508_v57 = vsel %vm500_vm12, %v496_v50, %v504_v54 }
 0x4e3   :  { %v515_v59 = vsel %vm940_vm11, %v511_v56, -1e+30  ;;  %v512_v60 = vsel %vm918_vm14, %v508_v57, -1e+30  ;;  %v509_v61 = vsel %vm501_vm13, %v497_v51, %v505_v55  ;;  %v510_v1 = vsel %vm502_vm15, %v498_v52, %v506_v58 }
 0x4e4   :  { %v525_v62 = vsel %vm283_vm1, %v515_v59, -inf  ;;  %v516_v63 = vsel %vm283_vm1, %v512_v60, -inf  ;;  %v513_v0 = vsel %vm922_vm2, %v509_v61, -1e+30  ;;  %v514_v35 = vsel %vm932_vm6, %v510_v1, -1e+30 }
 0x4e5   :  { %526 = vmax.xlane.f32.xlu0 %v525_v62  ;;  %517 = vmax.xlane.f32.xlu1 %v516_v63  ;;  %v519_v2 = vsel %vm283_vm1, %v513_v0, -inf  ;;  %v522_v20 = vsel %vm283_vm1, %v514_v35, -inf  ;;  %vm649_vm14 = vcmask 253952  }
 0x4e9   :  { %520 = vmax.xlane.f32.xlu1 %v519_v2 }
 0x4ed   :  { %523 = vmax.xlane.f32.xlu1 %v522_v20 }
 0x572   :  { %v518_v3 = vpop.xlane.xlu1 %517  ;;  %v527_v12 = vpop.xlane.xlu0 %526 }
 0x573   :  { %v528_v4 = vsub.f32 %v512_v60, %v518_v3  ;;  %v531_v23 = vsub.f32 %v515_v59, %v527_v12 }
 0x575   :  { %v532_v8 = vmul.f32 1.442695, %v528_v4  ;;  %v538_v19 = vmul.f32 1.442695, %v531_v23 }
 0x576   :  { %v521_v9 = vpop.xlane.xlu1 %520 }
 0x577   :  { %v529_v14 = vsub.f32 %v513_v0, %v521_v9  ;;  %748 = vpow2.f32 %v532_v8 }
 0x579   :  { %v534_v15 = vmul.f32 1.442695, %v529_v14 }
 0x57a   :  { %v524_v16 = vpop.xlane.xlu1 %523 }
 0x57b   :  { %750 = vpow2.f32 %v534_v15  ;;  %v530_v17 = vsub.f32 %v514_v35, %v524_v16 }
 0x57d   :  { %v536_v18 = vmul.f32 1.442695, %v530_v17 }
 0x57f   :  { %752 = vpow2.f32 %v536_v18 }
 0x580   :  { %754 = vpow2.f32 %v538_v19 }
 0x581   :  { %v749_v31 = vpop.eup %748 }
 0x582   :  { %v540_v21 = vsel %vm283_vm1, %v749_v31, 0.0 }
 0x583   :  { %541 = vadd.xlane.f32.xlu1 %v540_v21 }
 0x585   :  { %v751_v5 = vpop.eup %750 }
 0x586   :  { %v543_v22 = vsel %vm283_vm1, %v751_v5, 0.0 }
 0x587   :  { %544 = vadd.xlane.f32.xlu1 %v543_v22 }
 0x589   :  { %v753_v24 = vpop.eup %752 }
 0x58a   :  { %v546_v25 = vsel %vm283_vm1, %v753_v24, 0.0  ;;  %v755_v26 = vpop.eup %754 }
 0x58b   :  { %547 = vadd.xlane.f32.xlu1 %v546_v25  ;;  %v549_v27 = vsel %vm283_vm1, %v755_v26, 0.0 }
 0x58f   :  { %550 = vadd.xlane.f32.xlu1 %v549_v27 }
 0x610   :  { %v542_v10 = vpop.xlane.xlu1 %541 }
 0x611   :  { %756 = vrcp.f32 %v542_v10 }
 0x614   :  { %v545_v28 = vpop.xlane.xlu1 %544 }
 0x615   :  { %758 = vrcp.f32 %v545_v28 }
 0x618   :  { %v548_v29 = vpop.xlane.xlu1 %547 }
 0x619   :  { %760 = vrcp.f32 %v548_v29 }
 0x61b   :  { %v757_v32 = vpop.eup %756 }
 0x61c   :  { %v551_v33 = vpop.xlane.xlu1 %550  ;;  %v556_v11 = vmul.f32 %v757_v32, %v749_v31 }
 0x61d   :  { %762 = vrcp.f32 %v551_v33 }
 0x61e   :  { %v564_v30 = vmul.f32 %v563_v6, %v556_v11 }
 0x61f   :  { %v759_v34 = vpop.eup %758 }
 0x620   :  { %v568_v36 = vsel %vm283_vm1, %v564_v30, 0.0  ;;  %v557_v37 = vmul.f32 %v759_v34, %v751_v5 }
 0x621   :  { %569 = vadd.xlane.f32.xlu1 %v568_v36 }
 0x622   :  { %v565_v38 = vmul.f32 %v563_v6, %v557_v37 }
 0x623   :  { %v761_v13 = vpop.eup %760 }
 0x624   :  { %v571_v39 = vsel %vm283_vm1, %v565_v38, 0.0  ;;  %v558_v40 = vmul.f32 %v761_v13, %v753_v24 }
 0x625   :  { %572 = vadd.xlane.f32.xlu1 %v571_v39 }
 0x626   :  { %v566_v41 = vmul.f32 %v563_v6, %v558_v40 }
 0x627   :  { %v763_v43 = vpop.eup %762 }
 0x628   :  { %v574_v44 = vsel %vm283_vm1, %v566_v41, 0.0  ;;  %v559_v7 = vmul.f32 %v763_v43, %v755_v26 }
 0x629   :  { %575 = vadd.xlane.f32.xlu1 %v574_v44 }
 0x62a   :  { %v567_v42 = vmul.f32 %v563_v6, %v559_v7 }
 0x62c   :  { %v577_v45 = vsel %vm283_vm1, %v567_v42, 0.0 }
 0x62d   :  { %578 = vadd.xlane.f32.xlu1 %v577_v45 }
 0x6ae   :  { %v570_v47 = vpop.xlane.xlu1 %569 }
 0x6af   :  { %v581_v48 = vadd.f32 %v580_v46, %v570_v47 }
 0x6b1   :  { %v585_v49 = vsub.f32 %v581_v48, %v581_v48 }
 0x6b2   :  { %v573_v50 = vpop.xlane.xlu1 %572 }
 0x6b3   :  { %v589_v51 = vmul.f32 1.442695, %v585_v49  ;;  %v582_v52 = vadd.f32 %v580_v46, %v573_v50 }
 0x6b5   :  { %764 = vpow2.f32 %v589_v51  ;;  %v586_v53 = vsub.f32 %v582_v52, %v582_v52 }
 0x6b6   :  { %v576_v54 = vpop.xlane.xlu1 %575 }
 0x6b7   :  { %v591_v55 = vmul.f32 1.442695, %v586_v53  ;;  %v583_v56 = vadd.f32 %v580_v46, %v576_v54 }
 0x6b9   :  { %766 = vpow2.f32 %v591_v55  ;;  %v587_v57 = vsub.f32 %v583_v56, %v583_v56 }
 0x6ba   :  { %v579_v58 = vpop.xlane.xlu1 %578 }
 0x6bb   :  { %v593_v59 = vmul.f32 1.442695, %v587_v57  ;;  %v584_v60 = vadd.f32 %v580_v46, %v579_v58 }
 0x6bd   :  { %768 = vpow2.f32 %v593_v59  ;;  %v588_v61 = vsub.f32 %v584_v60, %v584_v60 }
 0x6bf   :  { %v765_v62 = vpop.eup %764  ;;  %v595_v63 = vmul.f32 1.442695, %v588_v61 }
 0x6c0   :  { %770 = vlog2.f32 %v765_v62 }
 0x6c1   :  { %772 = vpow2.f32 %v595_v63 }
 0x6c3   :  { %v767_v0 = vpop.eup %766 }
 0x6c4   :  { %774 = vlog2.f32 %v767_v0 }
 0x6c7   :  { %v769_v1 = vpop.eup %768 }
 0x6c8   :  { %776 = vlog2.f32 %v769_v1 }
 0x6ca   :  { %v771_v2 = vpop.eup %770 }
 0x6cb   :  { %v773_v35 = vpop.eup %772  ;;  %v602_v20 = vmul.f32 0.6931472, %v771_v2 }
 0x6cc   :  { %778 = vlog2.f32 %v773_v35 }
 0x6cd   :  { %v609_v3 = vadd.f32 %v602_v20, %v581_v48 }
 0x6ce   :  { %v775_v4 = vpop.eup %774 }
 0x6cf   :  { %v613_v8 = vsub.f32 %v581_v48, %v609_v3  ;;  %v604_v9 = vmul.f32 0.6931472, %v775_v4 }
 0x6d1   :  { %v610_v12 = vadd.f32 %v604_v9, %v582_v52  ;;  %617 = vxpose.xlu1.b32.start [1/4] (short) (narrow) %v613_v8, 8 }
 0x6d2   :  { %v777_v14 = vpop.eup %776 }
 0x6d3   :  { %v614_v15 = vsub.f32 %v582_v52, %v610_v12  ;;  %v606_v23 = vmul.f32 0.6931472, %v777_v14 }
 0x6d5   :  { %v611_v16 = vadd.f32 %v606_v23, %v583_v56  ;;  %618 = vxpose.xlu1.b32.cont [2/4] (short) (narrow) %v614_v15, 8 }
 0x6d6   :  { %v779_v17 = vpop.eup %778 }
 0x6d7   :  { %v615_v18 = vsub.f32 %v583_v56, %v611_v16  ;;  %v608_v19 = vmul.f32 0.6931472, %v779_v17 }
 0x6d9   :  { %v612_v31 = vadd.f32 %v608_v19, %v584_v60  ;;  %619 = vxpose.xlu1.b32.cont [3/4] (short) (narrow) %v615_v18, 8 }
 0x6db   :  { %v616_v21 = vsub.f32 %v584_v60, %v612_v31 }
 0x6dd   :  { %620 = vxpose.xlu1.b32.end [4/4] (short) (narrow) %v616_v21, 8 }
 0x751   :  { %v633_v5 = vpop.trf.xlu1 }
 0x752   :  { %650 = vst.msk [vmem:[#allocation5] sm:$0x1] %vm649_vm14, %v633_v5 }
 0x753   :  { %803 = shalt.err (!%p800_p9)
}
 0x754   :  { %s804_s11 = scalar_lea.hbm %s1006_s4, 16 }
 0x755   :  { %p805_p10 = scmp.ne.s32.totalorder %s1006_s4, %s804_s11  ;;  %p808_p11 = scmp.lt.u32.totalorder %s804_s11, %s1006_s4 }
 0x757   :  { %p810_p12 = pnand %p808_p11, %p805_p10 }
 0x759   :  { %813 = shalt.err (!%p810_p12)
}
 0x75a   :  { %660 = dma.vmem_to_hbm [thread:$0]  %s658_s6, 16, %s1006_s4, [#allocation3]  }
 0x75b   :  { %816 = dma.done.wait [#allocation3], 16  }
 0x75c   :  { %817 = vsyncadd [#allocation3], 4294967280 }
 0x75d   :  { %664 = vsyncpa [#allocation3], 1 }
 0x75e   :  { %665 = vsyncpa [#allocation4], 1 }

</bundles_post_ra>
